<compile_context>
chip_gen: v7x
topology: tpu7x:2x2x1
jax: 0.10.0
libtpu: 0.0.40
codegen_flags: <defaults>
</compile_context>

<pallas_src>
import functools

import jax
import jax.numpy as jnp
from jax.experimental import pallas as pl
from jax.experimental.pallas import tpu as pltpu

IN_F = 20
HID_F = 10
OUT_F = 30

PALLAS_MIN_ROWS = 1024   # below one tile, XLA's fused GEMVs win (no pipelining)
_DEFAULT_SCOPED_VMEM = 16 << 20   # conservative (v5e default scoped VMEM)


def _default_tm():
    """Batch row tile, sized against the lane-padded VMEM footprint."""
    try:
        kind = jax.devices()[0].device_kind.lower()
    except Exception:  # pragma: no cover - backend not initialised
        return 4096
    if "v5" in kind:           # v5e: 16 MiB default scoped VMEM
        return 4096            # ~8 MiB padded, fits without raising the limit
    return 8192                # v6e / v7x: ~16 MiB padded double-buffered


DEFAULT_TM = _default_tm()


def _mlp_kernel(x_ref, w1_ref, b1_ref, w2_ref, b2_ref, o_ref):
    # Fused: (linear1 + folded residual) -> relu -> linear2 on one (TM,*) tile.
    x = x_ref[...]                                                    # (TM, 20)
    h = jnp.dot(x, w1_ref[...],
                preferred_element_type=jnp.float32) + b1_ref[...]     # (TM, 10)
    h = jnp.maximum(h, 0.0)                                           # relu
    y = jnp.dot(h, w2_ref[...],
                preferred_element_type=jnp.float32) + b2_ref[...]     # (TM, 30)
    o_ref[...] = y.astype(o_ref.dtype)


def _reference(x, w1, b1, w2, b2):
    # Same (deviating) semantics as the kernel: residual over x[:, :10].
    v1 = x @ w1 + b1
    v2 = v1 + x[:, :HID_F]
    v3 = jnp.maximum(v2, 0.0)
    return v3 @ w2 + b2


@functools.partial(jax.jit, static_argnames=("tm", "force_pallas"))
def model_forward(x, w1, b1, w2, b2, *, tm=DEFAULT_TM, force_pallas=False):
    """x: (N, 20); w1: (20, 10); b1: (10,); w2: (10, 30); b2: (30,)."""
    n = x.shape[0]

    if n < PALLAS_MIN_ROWS and not force_pallas:
        # Tiny batch: pallas_call launch overhead dwarfs the work; let XLA
        # fuse the two GEMVs instead.
        return _reference(x, w1, b1, w2, b2).astype(x.dtype)

    # Fold the residual (v1 + x[:, :10]) into W1: x @ (w1 + [[I],[0]]) + b1.
    # One-time, tiny (20x10) wrapper-side prep; removes a VPU add + lane slice
    # from the kernel body.
    proj = jnp.concatenate(
        [jnp.eye(HID_F, dtype=w1.dtype),
         jnp.zeros((IN_F - HID_F, HID_F), dtype=w1.dtype)], axis=0)
    w1_eff = w1 + proj

    # Block row count: either a multiple-of-8 tile, or the full batch dim.
    block_m = tm if n >= tm else n
    grid = (pl.cdiv(n, block_m),)

    # Real padded VMEM footprint: input (.,20) and output (.,30) blocks both
    # pad to 128 lanes -> 512 B/row/buffer (f32), double-buffered in and out.
    stream_bytes = block_m * 128 * 4 * 2 * 2
    vmem_limit = None
    if stream_bytes + (2 << 20) > _DEFAULT_SCOPED_VMEM:
        vmem_limit = min(stream_bytes + (8 << 20), 48 << 20)  # < v7x 64 MiB

    weight_bytes = (w1.size + b1.size + w2.size + b2.size) * 4
    cost = pl.CostEstimate(
        flops=2 * n * (IN_F * HID_F + HID_F * OUT_F),
        transcendentals=0,
        bytes_accessed=n * (IN_F + OUT_F) * x.dtype.itemsize + weight_bytes,
    )

    return pl.pallas_call(
        _mlp_kernel,
        out_shape=jax.ShapeDtypeStruct((n, OUT_F), x.dtype),
        grid=grid,
        in_specs=[
            # streamed, batch-tiled input
            pl.BlockSpec((block_m, IN_F), lambda i: (i, 0)),
            # weights / biases: constant block index -> resident across steps
            pl.BlockSpec((IN_F, HID_F), lambda i: (0, 0)),
            pl.BlockSpec((1, HID_F), lambda i: (0, 0)),
            pl.BlockSpec((HID_F, OUT_F), lambda i: (0, 0)),
            pl.BlockSpec((1, OUT_F), lambda i: (0, 0)),
        ],
        out_specs=pl.BlockSpec((block_m, OUT_F), lambda i: (i, 0)),
        compiler_params=pltpu.CompilerParams(
            dimension_semantics=("parallel",),
            vmem_limit_bytes=vmem_limit),
        cost_estimate=cost,
    )(x, w1_eff, b1.reshape(1, HID_F), w2, b2.reshape(1, OUT_F))


if __name__ == "__main__":
    key = jax.random.PRNGKey(0)
    kx, kxs, k1, kb1, k2, kb2 = jax.random.split(key, 6)

    # Deterministic parameter init (PyTorch-like uniform bounds).
    lim1 = 1.0 / (IN_F ** 0.5)
    w1 = jax.random.uniform(k1, (IN_F, HID_F), jnp.float32, -lim1, lim1)
    b1 = jax.random.uniform(kb1, (HID_F,), jnp.float32, -lim1, lim1)
    lim2 = 1.0 / (HID_F ** 0.5)
    w2 = jax.random.uniform(k2, (HID_F, OUT_F), jnp.float32, -lim2, lim2)
    b2 = jax.random.uniform(kb2, (OUT_F,), jnp.float32, -lim2, lim2)

    # 1) Pallas kernel path: small batch tile to exercise a multi-step,
    #    double-buffered grid (grid = 4 steps at tm=256).
    n_big = 1024
    x_big = jax.random.normal(kx, (n_big, IN_F), dtype=jnp.float32)
    out_big = model_forward(x_big, w1, b1, w2, b2, tm=256)
    jax.block_until_ready(out_big)
    ref_big = _reference(x_big, w1, b1, w2, b2)
    assert out_big.shape == (n_big, OUT_F)
    assert jnp.allclose(out_big, ref_big, atol=1e-5, rtol=1e-5), \
        "kernel path mismatch vs reference"

    # 1b) Single-step kernel path where block_m == n (n < default tm).
    out_one = model_forward(x_big, w1, b1, w2, b2, force_pallas=True)
    jax.block_until_ready(out_one)
    assert jnp.allclose(out_one, ref_big, atol=1e-5, rtol=1e-5), \
        "single-step kernel path mismatch vs reference"

    # 2) Original module's shape (N=1): tiny-batch dispatch (XLA-fused path).
    x_small = jax.random.normal(kxs, (1, IN_F), dtype=jnp.float32)
    out_small = model_forward(x_small, w1, b1, w2, b2)
    jax.block_until_ready(out_small)
    ref_small = _reference(x_small, w1, b1, w2, b2)
    assert out_small.shape == (1, OUT_F)
    assert jnp.allclose(out_small, ref_small, atol=1e-5, rtol=1e-5), \
        "small-batch path mismatch vs reference"

    print("KERNEL_OK")
</pallas_src>

<mosaic_0001>
module attributes {stable_mosaic.version = 11 : i64} {
  func.func @_mlp_kernel(%arg0: i32, %arg1: memref<256x20xf32, #tpu.memory_space<vmem>>, %arg2: memref<20x10xf32, #tpu.memory_space<vmem>>, %arg3: memref<1x10xf32, #tpu.memory_space<vmem>>, %arg4: memref<10x30xf32, #tpu.memory_space<vmem>>, %arg5: memref<1x30xf32, #tpu.memory_space<vmem>>, %arg6: memref<256x30xf32, #tpu.memory_space<vmem>>) attributes {dimension_semantics = [#tpu.dimension_semantics<parallel>], iteration_bounds = array<i64: 4>, scalar_prefetch = 0 : i64, scratch_operands = 0 : i64, tpu.core_type = #tpu.core_type<tc>, window_params = [{transform_indices = @transform_0, window_bounds = array<i64: 256, 20>}, {pipeline_mode = #tpu.pipeline_mode<synchronous>, transform_indices = @transform_1, window_bounds = array<i64: 20, 10>}, {pipeline_mode = #tpu.pipeline_mode<synchronous>, transform_indices = @transform_2, window_bounds = array<i64: 1, 10>}, {pipeline_mode = #tpu.pipeline_mode<synchronous>, transform_indices = @transform_3, window_bounds = array<i64: 10, 30>}, {pipeline_mode = #tpu.pipeline_mode<synchronous>, transform_indices = @transform_4, window_bounds = array<i64: 1, 30>}, {transform_indices = @transform_5, window_bounds = array<i64: 256, 30>}]} {
    %c0 = arith.constant 0 : index
    %c0_0 = arith.constant 0 : index
    %0 = vector.load %arg1[%c0, %c0_0] : memref<256x20xf32, #tpu.memory_space<vmem>>, vector<256x20xf32>
    %c0_1 = arith.constant 0 : index
    %c0_2 = arith.constant 0 : index
    %1 = vector.load %arg2[%c0_1, %c0_2] : memref<20x10xf32, #tpu.memory_space<vmem>>, vector<20x10xf32>
    %cst = arith.constant dense<0.000000e+00> : vector<256x10xf32>
    %2 = tpu.matmul %0, %1, %cst {dimension_numbers = #tpu.dot_dimension_numbers<[1], [0], [0], [1], [0, 0, 1, 1], [], []>} : vector<256x20xf32>, vector<20x10xf32>, vector<256x10xf32> -> vector<256x10xf32>
    %c0_3 = arith.constant 0 : index
    %c0_4 = arith.constant 0 : index
    %3 = vector.load %arg3[%c0_3, %c0_4] : memref<1x10xf32, #tpu.memory_space<vmem>>, vector<1x10xf32>
    %4 = vector.broadcast %3 : vector<1x10xf32> to vector<256x10xf32>
    %5 = arith.addf %2, %4 : vector<256x10xf32>
    %cst_5 = arith.constant 0.000000e+00 : f32
    %6 = vector.broadcast %cst_5 : f32 to vector<256x10xf32>
    %7 = arith.maximumf %5, %6 : vector<256x10xf32>
    %c0_6 = arith.constant 0 : index
    %c0_7 = arith.constant 0 : index
    %8 = vector.load %arg4[%c0_6, %c0_7] : memref<10x30xf32, #tpu.memory_space<vmem>>, vector<10x30xf32>
    %cst_8 = arith.constant dense<0.000000e+00> : vector<256x30xf32>
    %9 = tpu.matmul %7, %8, %cst_8 {dimension_numbers = #tpu.dot_dimension_numbers<[1], [0], [0], [1], [0, 0, 1, 1], [], []>} : vector<256x10xf32>, vector<10x30xf32>, vector<256x30xf32> -> vector<256x30xf32>
    %c0_9 = arith.constant 0 : index
    %c0_10 = arith.constant 0 : index
    %10 = vector.load %arg5[%c0_9, %c0_10] : memref<1x30xf32, #tpu.memory_space<vmem>>, vector<1x30xf32>
    %11 = vector.broadcast %10 : vector<1x30xf32> to vector<256x30xf32>
    %12 = arith.addf %9, %11 : vector<256x30xf32>
    %c0_11 = arith.constant 0 : index
    %c0_12 = arith.constant 0 : index
    %13 = vector.load %arg6[%c0_11, %c0_12] : memref<256x30xf32, #tpu.memory_space<vmem>>, vector<256x30xf32>
    tpu.vector_store %arg6[%c0_11, %c0_12], %12 {strides = array<i32>} : memref<256x30xf32, #tpu.memory_space<vmem>>, vector<256x30xf32>,
    return
  }
  func.func @transform_0(%arg0: i32) -> (i32, i32) {
    %c0_i32 = arith.constant 0 : i32
    %c0_i32_0 = arith.constant 0 : i32
    return %arg0, %c0_i32 : i32, i32
  }
  func.func @transform_1(%arg0: i32) -> (i32, i32) {
    %c0_i32 = arith.constant 0 : i32
    %c0_i32_0 = arith.constant 0 : i32
    %c0_i32_1 = arith.constant 0 : i32
    return %c0_i32, %c0_i32_0 : i32, i32
  }
  func.func @transform_2(%arg0: i32) -> (i32, i32) {
    %c0_i32 = arith.constant 0 : i32
    %c0_i32_0 = arith.constant 0 : i32
    %c0_i32_1 = arith.constant 0 : i32
    return %c0_i32, %c0_i32_0 : i32, i32
  }
  func.func @transform_3(%arg0: i32) -> (i32, i32) {
    %c0_i32 = arith.constant 0 : i32
    %c0_i32_0 = arith.constant 0 : i32
    %c0_i32_1 = arith.constant 0 : i32
    return %c0_i32, %c0_i32_0 : i32, i32
  }
  func.func @transform_4(%arg0: i32) -> (i32, i32) {
    %c0_i32 = arith.constant 0 : i32
    %c0_i32_0 = arith.constant 0 : i32
    %c0_i32_1 = arith.constant 0 : i32
    return %c0_i32, %c0_i32_0 : i32, i32
  }
  func.func @transform_5(%arg0: i32) -> (i32, i32) {
    %c0_i32 = arith.constant 0 : i32
    %c0_i32_0 = arith.constant 0 : i32
    return %arg0, %c0_i32 : i32, i32
  }
}

</mosaic_0001>

<bundles_post_ra>
// kernel: model_forward.1
= control target key start
LH: loop header
LB: loop body
LE: loop exit
PB: predicated region body
PF: predicated region fallthrough
CT: control target
= control target key end

     0   :  { %s1364_s18 = smov 0   ;;  %s1641_s0 = inlined_call_operand.vmem [shape: f32[1024,20], index: 0, kind: input, shape index: {}]   ;;  %s1642_s1 = inlined_call_operand.vmem [shape: f32[20,10], index: 1, kind: input, shape index: {}]   ;;  %s1643_s2 = inlined_call_operand.vmem [shape: f32[1,10], index: 2, kind: input, shape index: {}]   ;;  %s1644_s3 = inlined_call_operand.vmem [shape: f32[10,30], index: 3, kind: input, shape index: {}]   ;;  %s1645_s4 = inlined_call_operand.vmem [shape: f32[1,30], index: 4, kind: input, shape index: {}]   ;;  %s1646_s5 = inlined_call_operand.vmem [shape: f32[1024,30], index: 5, kind: output, shape index: {}]  }
   0x1 LB: > { %s1052_s19 = sadd.s32 4294967295, %s1331_s18   ;;  %p1056_p0 = scmp.ge.s32.totalorder %s1331_s18, 1  ;;  %s1331_s18 = sphi %s1364_s18, %s15_s18  }
   0x2   : > { %p188_p1 = scmp.lt.s32.totalorder %s1331_s18, 5 }
   0x4   : > { %p189_p2 = pnand %p1056_p0, %p188_p1 }
   0x5   : > { %v260_v0 = vld [vmem:[%s1642_s1] sm:$0xff] (!%p189_p2)  ;;  %v261_v1 = vld [vmem:[%s1642_s1 + $0x8] sm:$0xff] (!%p189_p2)  ;;  %s1057_s24 = sshll.u32 (!%p189_p2), %s1052_s19, 5  ;;  %v262_v3 = vld [vmem:[%s1642_s1 + $0x10] sm:$0xf] (!%p189_p2)  ;;  %vm367_vm0 = vcmask (!%p189_p2), 1043456  }
   0x6   : > { %192 = sbr.rel (%p189_p2) target bundleno = 512 (0x200), region = 40  ;;  %v1306_v2 = vpack.c.bf16 (!%p189_p2), %v261_v1, %v260_v0  ;;  %p217_p3 = scmp.lt.s32.totalorder (!%p189_p2), %s1057_s24, 127  ;;  %vm270_vm1 = vcmask (!%p189_p2), 162816   ;;  %v628_v36 = vld [vmem:[%s1644_s3] sm:$0xff] (!%p189_p2)  ;;  %v629_v37 = vld [vmem:[%s1644_s3 + $0x8] sm:$0x3] (!%p189_p2) }
   0x7   : > { %vm734_vm2 = vcmask (!%p189_p2), 1041408   ;;  %v1310_v38 = vpack.c.bf16 (!%p189_p2), %v629_v37, %v628_v36  ;;  %vm1333_vm3 = vmmov (!%p189_p2), 1   ;;  %v1464_v39 = vld [vmem:[%s1643_s2] ss:$0 sm:$0xff] (!%p189_p2)  ;;  %vm637_vm5 = vcmask (!%p189_p2), 80896  }
   0x8   : > { %1307 = vmatprep.subr.bf16.mxu0 (!%p189_p2), %v1306_v2  ;;  %vm1311_vm4 = vmpackc.low (!%p189_p2), %vm734_vm2, %vm1333_vm3  ;;  %vm963_vm6 = vcmask (!%p189_p2), 244736  }
   0x9   : > { %1309 = vmatpush3.bf16.msra.mxu0 (!%p189_p2), %v1306_v2  ;;  %1312 = vmatprep.subr.msk.bf16.mxu1 (!%p189_p2), %vm1311_vm4, %v1310_v38 }
   0xa   : > { %1204 = vmatprep.subr.msk.mxu0 (!%p189_p2), %vm367_vm0, %v262_v3  ;;  %1315 = vmatpush3.bf16.msk.msra.mxu1 (!%p189_p2), %vm1311_vm4, %v1310_v38 }
   0xd   : > { %s1648_s24 = smov (!%p217_p3, %s1057_s24), 127  ;;  %1205 = vmatpush3.msk.msra.mxu0 %vm367_vm0, %v262_v3 }
   0xe   : > { %s1058_s27 = sshll.u32 %s1648_s24, 3 }
   0xf   : > { %s1389_s30 = scalar_lea.vmem %s1641_s0, %s1058_s27  ;;  %s1540_s16 = scalar_lea.vmem %s1646_s5, %s1058_s27 }
  0x10   : > { %v228_v4 = vld [vmem:[%s1389_s30] sm:$0xff]  ;;  %v229_v5 = vld [vmem:[%s1389_s30 + $0x8] sm:$0xff]  ;;  %v230_v6 = vld [vmem:[%s1389_s30 + $0x10] sm:$0xff] }
  0x11   : > { %1206 = vmatprep.mubr.msk.f32.mxu0 %vm270_vm1, %v228_v4  ;;  %v231_v7 = vld [vmem:[%s1389_s30 + $0x18] sm:$0xff]  ;;  %v232_v8 = vld [vmem:[%s1389_s30 + $0x20] sm:$0xff]  ;;  %v233_v9 = vld [vmem:[%s1389_s30 + $0x28] sm:$0xff] }
  0x12   : > { %1207 = vmatmul.mubr.msk.f32.vlgmr.msra.gmra.mrb[0].mxu0 %vm270_vm1, %v229_v5  ;;  %v234_v10 = vld [vmem:[%s1389_s30 + $0x30] sm:$0xff]  ;;  %v235_v11 = vld [vmem:[%s1389_s30 + $0x38] sm:$0xff]  ;;  %v236_v12 = vld [vmem:[%s1389_s30 + $0x40] sm:$0xff] }
  0x13   : > { %1209 = vmatprep.mubr.msk.f32.mxu0 %vm270_vm1, %v230_v6  ;;  %v237_v13 = vld [vmem:[%s1389_s30 + $0x48] sm:$0xff]  ;;  %v238_v14 = vld [vmem:[%s1389_s30 + $0x50] sm:$0xff]  ;;  %v239_v15 = vld [vmem:[%s1389_s30 + $0x58] sm:$0xff] }
  0x14   : > { %v240_v16 = vld [vmem:[%s1389_s30 + $0x60] sm:$0xff]  ;;  %v241_v17 = vld [vmem:[%s1389_s30 + $0x68] sm:$0xff]  ;;  %v242_v18 = vld [vmem:[%s1389_s30 + $0x70] sm:$0xff] }
  0x15   : > { %v243_v19 = vld [vmem:[%s1389_s30 + $0x78] sm:$0xff]  ;;  %v244_v20 = vld [vmem:[%s1389_s30 + $0x80] sm:$0xff]  ;;  %v245_v21 = vld [vmem:[%s1389_s30 + $0x88] sm:$0xff] }
  0x16   : > { %1210 = vmatmul.mubr.msk.f32.gmra.mrb[2].mxu0 %vm270_vm1, %v231_v7  ;;  %v246_v22 = vld [vmem:[%s1389_s30 + $0x90] sm:$0xff]  ;;  %v247_v23 = vld [vmem:[%s1389_s30 + $0x98] sm:$0xff]  ;;  %v248_v24 = vld [vmem:[%s1389_s30 + $0xa0] sm:$0xff] }
  0x17   : > { %1212 = vmatprep.mubr.msk.f32.mxu0 %vm270_vm1, %v232_v8  ;;  %v249_v25 = vld [vmem:[%s1389_s30 + $0xa8] sm:$0xff]  ;;  %v250_v26 = vld [vmem:[%s1389_s30 + $0xb0] sm:$0xff]  ;;  %v251_v27 = vld [vmem:[%s1389_s30 + $0xb8] sm:$0xff] }
  0x18   : > { %v252_v28 = vld [vmem:[%s1389_s30 + $0xc0] sm:$0xff]  ;;  %v253_v29 = vld [vmem:[%s1389_s30 + $0xc8] sm:$0xff]  ;;  %v254_v30 = vld [vmem:[%s1389_s30 + $0xd0] sm:$0xff] }
  0x19   : > { %v255_v31 = vld [vmem:[%s1389_s30 + $0xd8] sm:$0xff]  ;;  %v256_v32 = vld [vmem:[%s1389_s30 + $0xe0] sm:$0xff]  ;;  %v257_v33 = vld [vmem:[%s1389_s30 + $0xe8] sm:$0xff] }
  0x1a   : > { %1213 = vmatmul.mubr.msk.f32.gmra.mrb[4].mxu0 %vm270_vm1, %v233_v9  ;;  %v258_v34 = vld [vmem:[%s1389_s30 + $0xf0] sm:$0xff]  ;;  %v259_v35 = vld [vmem:[%s1389_s30 + $0xf8] sm:$0xff] }
  0x1b   : > { %1215 = vmatprep.mubr.msk.f32.mxu0 %vm270_vm1, %v234_v10 }
  0x1e   : > { %1216 = vmatmul.mubr.msk.f32.gmra.mrb[6].mxu0 %vm270_vm1, %v235_v11 }
  0x1f   : > { %1218 = vmatprep.mubr.msk.f32.mxu0 %vm270_vm1, %v236_v12 }
  0x22   : > { %1219 = vmatmul.mubr.msk.f32.gmra.mrb[8].mxu0 %vm270_vm1, %v237_v13 }
  0x23   : > { %1221 = vmatprep.mubr.msk.f32.mxu0 %vm270_vm1, %v238_v14 }
  0x26   : > { %1222 = vmatmul.mubr.msk.f32.gmra.mrb[10].mxu0 %vm270_vm1, %v239_v15 }
  0x27   : > { %1224 = vmatprep.mubr.msk.f32.mxu0 %vm270_vm1, %v240_v16 }
  0x2a   : > { %1225 = vmatmul.mubr.msk.f32.gmra.mrb[12].mxu0 %vm270_vm1, %v241_v17 }
  0x2b   : > { %1227 = vmatprep.mubr.msk.f32.mxu0 %vm270_vm1, %v242_v18 }
  0x2e   : > { %1228 = vmatmul.mubr.msk.f32.gmra.mrb[14].mxu0 %vm270_vm1, %v243_v19 }
  0x2f   : > { %1230 = vmatprep.mubr.msk.f32.mxu0 %vm270_vm1, %v244_v20 }
  0x32   : > { %1231 = vmatmul.mubr.msk.f32.gmra.mrb[16].mxu0 %vm270_vm1, %v245_v21 }
  0x33   : > { %1233 = vmatprep.mubr.msk.f32.mxu0 %vm270_vm1, %v246_v22 }
  0x36   : > { %1234 = vmatmul.mubr.msk.f32.gmra.mrb[18].mxu0 %vm270_vm1, %v247_v23 }
  0x37   : > { %1236 = vmatprep.mubr.msk.f32.mxu0 %vm270_vm1, %v248_v24 }
  0x3a   : > { %1237 = vmatmul.mubr.msk.f32.gmra.mrb[20].mxu0 %vm270_vm1, %v249_v25 }
  0x3b   : > { %1239 = vmatprep.mubr.msk.f32.mxu0 %vm270_vm1, %v250_v26 }
  0x3e   : > { %1240 = vmatmul.mubr.msk.f32.gmra.mrb[22].mxu0 %vm270_vm1, %v251_v27 }
  0x3f   : > { %1242 = vmatprep.mubr.msk.f32.mxu0 %vm270_vm1, %v252_v28 }
  0x42   : > { %1243 = vmatmul.mubr.msk.f32.gmra.mrb[24].mxu0 %vm270_vm1, %v253_v29 }
  0x43   : > { %1245 = vmatprep.mubr.msk.f32.mxu0 %vm270_vm1, %v254_v30 }
  0x46   : > { %1246 = vmatmul.mubr.msk.f32.gmra.mrb[26].mxu0 %vm270_vm1, %v255_v31 }
  0x47   : > { %1248 = vmatprep.mubr.msk.f32.mxu0 %vm270_vm1, %v256_v32 }
  0x4a   : > { %1249 = vmatmul.mubr.msk.f32.gmra.mrb[28].mxu0 %vm270_vm1, %v257_v33 }
  0x4b   : > { %1251 = vmatprep.mubr.msk.f32.mxu0 %vm270_vm1, %v258_v34 }
  0x4e   : > { %1252 = vmatmul.mubr.msk.f32.gmra.mrb[30].mxu0 %vm270_vm1, %v259_v35 }
  0xe5   : > { %v1208_v40 = vpop.f32.mrb[0].mxu0 }
  0xe6   : > { %v443_v41 = vadd.f32 %v1208_v40, %v1464_v39  ;;  %v437_v42 = vpop.f32.mrb[1].mxu0 }
  0xe7   : > { %v438_v43 = vadd.f32 %v1464_v39, %v437_v42 }
  0xe8   : > { %v597_v46 = vmax.f32 %v443_v41, 0.0 }
  0xe9   : > { %v596_v44 = vmax.f32 %v438_v43, 0.0  ;;  %v1211_v45 = vpop.f32.mrb[2].mxu0 }
  0xea   : > { %v453_v47 = vadd.f32 %v1211_v45, %v1464_v39  ;;  %v447_v48 = vpop.f32.mrb[3].mxu0 }
  0xeb   : > { %v448_v49 = vadd.f32 %v1464_v39, %v447_v48  ;;  %1258 = vmatprep.mubr.msk.f32.mxu1 %vm637_vm5, %v596_v44 }
  0xec   : > { %1259 = vmatmul.mubr.msk.f32.vlgmr.msra.gmra.mrb[0].mxu1 %vm637_vm5, %v597_v46  ;;  %v599_v52 = vmax.f32 %v453_v47, 0.0 }
  0xed   : > { %v598_v50 = vmax.f32 %v448_v49, 0.0  ;;  %v1214_v51 = vpop.f32.mrb[4].mxu0 }
  0xee   : > { %v463_v53 = vadd.f32 %v1214_v51, %v1464_v39  ;;  %v457_v54 = vpop.f32.mrb[5].mxu0 }
  0xef   : > { %v458_v55 = vadd.f32 %v1464_v39, %v457_v54  ;;  %1261 = vmatprep.mubr.msk.f32.mxu1 %vm637_vm5, %v598_v50 }
  0xf0   : > { %1262 = vmatmul.mubr.msk.f32.gmra.mrb[2].mxu1 %vm637_vm5, %v599_v52  ;;  %v601_v58 = vmax.f32 %v463_v53, 0.0 }
  0xf1   : > { %v600_v56 = vmax.f32 %v458_v55, 0.0  ;;  %v1217_v57 = vpop.f32.mrb[6].mxu0 }
  0xf2   : > { %v473_v59 = vadd.f32 %v1217_v57, %v1464_v39  ;;  %v467_v60 = vpop.f32.mrb[7].mxu0 }
  0xf3   : > { %v468_v61 = vadd.f32 %v1464_v39, %v467_v60  ;;  %1264 = vmatprep.mubr.msk.f32.mxu1 %vm637_vm5, %v600_v56 }
  0xf4   : > { %1265 = vmatmul.mubr.msk.f32.gmra.mrb[4].mxu1 %vm637_vm5, %v601_v58  ;;  %v603_v0 = vmax.f32 %v473_v59, 0.0 }
  0xf5   : > { %v602_v62 = vmax.f32 %v468_v61, 0.0  ;;  %v1220_v63 = vpop.f32.mrb[8].mxu0 }
  0xf6   : > { %v483_v1 = vadd.f32 %v1220_v63, %v1464_v39  ;;  %v477_v2 = vpop.f32.mrb[9].mxu0 }
  0xf7   : > { %v478_v3 = vadd.f32 %v1464_v39, %v477_v2  ;;  %1267 = vmatprep.mubr.msk.f32.mxu1 %vm637_vm5, %v602_v62 }
  0xf8   : > { %1268 = vmatmul.mubr.msk.f32.gmra.mrb[6].mxu1 %vm637_vm5, %v603_v0  ;;  %v605_v6 = vmax.f32 %v483_v1, 0.0 }
  0xf9   : > { %v604_v4 = vmax.f32 %v478_v3, 0.0  ;;  %v1223_v5 = vpop.f32.mrb[10].mxu0 }
  0xfa   : > { %v493_v7 = vadd.f32 %v1223_v5, %v1464_v39  ;;  %v487_v8 = vpop.f32.mrb[11].mxu0 }
  0xfb   : > { %v488_v9 = vadd.f32 %v1464_v39, %v487_v8  ;;  %1270 = vmatprep.mubr.msk.f32.mxu1 %vm637_vm5, %v604_v4 }
  0xfc   : > { %1271 = vmatmul.mubr.msk.f32.gmra.mrb[8].mxu1 %vm637_vm5, %v605_v6  ;;  %v607_v12 = vmax.f32 %v493_v7, 0.0 }
  0xfd   : > { %v606_v10 = vmax.f32 %v488_v9, 0.0  ;;  %v1226_v11 = vpop.f32.mrb[12].mxu0  ;;  %v1533_v9 = vld [vmem:[%s1645_s4] ss:$0 sm:$0xff] }
  0xfe   : > { %v503_v13 = vadd.f32 %v1226_v11, %v1464_v39  ;;  %v497_v14 = vpop.f32.mrb[13].mxu0 }
  0xff   : > { %v498_v15 = vadd.f32 %v1464_v39, %v497_v14  ;;  %1273 = vmatprep.mubr.msk.f32.mxu1 %vm637_vm5, %v606_v10 }
 0x100   : > { %1274 = vmatmul.mubr.msk.f32.gmra.mrb[10].mxu1 %vm637_vm5, %v607_v12  ;;  %v609_v18 = vmax.f32 %v503_v13, 0.0 }
 0x101   : > { %v608_v16 = vmax.f32 %v498_v15, 0.0  ;;  %v1229_v17 = vpop.f32.mrb[14].mxu0 }
 0x102   : > { %v513_v19 = vadd.f32 %v1229_v17, %v1464_v39  ;;  %v507_v20 = vpop.f32.mrb[15].mxu0 }
 0x103   : > { %v508_v21 = vadd.f32 %v1464_v39, %v507_v20  ;;  %1276 = vmatprep.mubr.msk.f32.mxu1 %vm637_vm5, %v608_v16 }
 0x104   : > { %1277 = vmatmul.mubr.msk.f32.gmra.mrb[12].mxu1 %vm637_vm5, %v609_v18  ;;  %v611_v24 = vmax.f32 %v513_v19, 0.0 }
 0x105   : > { %v610_v22 = vmax.f32 %v508_v21, 0.0  ;;  %v1232_v23 = vpop.f32.mrb[16].mxu0 }
 0x106   : > { %v523_v25 = vadd.f32 %v1232_v23, %v1464_v39  ;;  %v517_v26 = vpop.f32.mrb[17].mxu0 }
 0x107   : > { %v518_v27 = vadd.f32 %v1464_v39, %v517_v26  ;;  %1279 = vmatprep.mubr.msk.f32.mxu1 %vm637_vm5, %v610_v22 }
 0x108   : > { %1280 = vmatmul.mubr.msk.f32.gmra.mrb[14].mxu1 %vm637_vm5, %v611_v24  ;;  %v613_v30 = vmax.f32 %v523_v25, 0.0 }
 0x109   : > { %v612_v28 = vmax.f32 %v518_v27, 0.0  ;;  %v1235_v29 = vpop.f32.mrb[18].mxu0 }
 0x10a   : > { %v533_v31 = vadd.f32 %v1235_v29, %v1464_v39  ;;  %v527_v32 = vpop.f32.mrb[19].mxu0 }
 0x10b   : > { %v528_v33 = vadd.f32 %v1464_v39, %v527_v32  ;;  %1282 = vmatprep.mubr.msk.f32.mxu1 %vm637_vm5, %v612_v28 }
 0x10c   : > { %1283 = vmatmul.mubr.msk.f32.gmra.mrb[16].mxu1 %vm637_vm5, %v613_v30  ;;  %v615_v36 = vmax.f32 %v533_v31, 0.0 }
 0x10d   : > { %v614_v34 = vmax.f32 %v528_v33, 0.0  ;;  %v1238_v35 = vpop.f32.mrb[20].mxu0 }
 0x10e   : > { %v543_v37 = vadd.f32 %v1238_v35, %v1464_v39  ;;  %v537_v38 = vpop.f32.mrb[21].mxu0 }
 0x10f   : > { %v538_v40 = vadd.f32 %v1464_v39, %v537_v38  ;;  %1285 = vmatprep.mubr.msk.f32.mxu1 %vm637_vm5, %v614_v34 }
 0x110   : > { %1286 = vmatmul.mubr.msk.f32.gmra.mrb[18].mxu1 %vm637_vm5, %v615_v36  ;;  %v617_v43 = vmax.f32 %v543_v37, 0.0 }
 0x111   : > { %v616_v41 = vmax.f32 %v538_v40, 0.0  ;;  %v1241_v42 = vpop.f32.mrb[22].mxu0 }
 0x112   : > { %v553_v44 = vadd.f32 %v1241_v42, %v1464_v39  ;;  %v547_v45 = vpop.f32.mrb[23].mxu0 }
 0x113   : > { %v548_v46 = vadd.f32 %v1464_v39, %v547_v45  ;;  %1288 = vmatprep.mubr.msk.f32.mxu1 %vm637_vm5, %v616_v41 }
 0x114   : > { %1289 = vmatmul.mubr.msk.f32.gmra.mrb[20].mxu1 %vm637_vm5, %v617_v43  ;;  %v619_v49 = vmax.f32 %v553_v44, 0.0 }
 0x115   : > { %v618_v47 = vmax.f32 %v548_v46, 0.0  ;;  %v1244_v48 = vpop.f32.mrb[24].mxu0 }
 0x116   : > { %v563_v50 = vadd.f32 %v1244_v48, %v1464_v39  ;;  %v557_v51 = vpop.f32.mrb[25].mxu0 }
 0x117   : > { %v558_v52 = vadd.f32 %v1464_v39, %v557_v51  ;;  %1291 = vmatprep.mubr.msk.f32.mxu1 %vm637_vm5, %v618_v47 }
 0x118   : > { %1292 = vmatmul.mubr.msk.f32.gmra.mrb[22].mxu1 %vm637_vm5, %v619_v49  ;;  %v621_v55 = vmax.f32 %v563_v50, 0.0 }
 0x119   : > { %v620_v53 = vmax.f32 %v558_v52, 0.0  ;;  %v1247_v54 = vpop.f32.mrb[26].mxu0 }
 0x11a   : > { %v573_v56 = vadd.f32 %v1247_v54, %v1464_v39  ;;  %v567_v57 = vpop.f32.mrb[27].mxu0 }
 0x11b   : > { %v568_v58 = vadd.f32 %v1464_v39, %v567_v57  ;;  %1294 = vmatprep.mubr.msk.f32.mxu1 %vm637_vm5, %v620_v53 }
 0x11c   : > { %1295 = vmatmul.mubr.msk.f32.gmra.mrb[24].mxu1 %vm637_vm5, %v621_v55  ;;  %v623_v61 = vmax.f32 %v573_v56, 0.0 }
 0x11d   : > { %v622_v59 = vmax.f32 %v568_v58, 0.0  ;;  %v1250_v60 = vpop.f32.mrb[28].mxu0 }
 0x11e   : > { %v583_v62 = vadd.f32 %v1250_v60, %v1464_v39  ;;  %v577_v63 = vpop.f32.mrb[29].mxu0 }
 0x11f   : > { %v578_v0 = vadd.f32 %v1464_v39, %v577_v63  ;;  %1297 = vmatprep.mubr.msk.f32.mxu1 %vm637_vm5, %v622_v59 }
 0x120   : > { %1298 = vmatmul.mubr.msk.f32.gmra.mrb[26].mxu1 %vm637_vm5, %v623_v61  ;;  %v625_v3 = vmax.f32 %v583_v62, 0.0 }
 0x121   : > { %v624_v1 = vmax.f32 %v578_v0, 0.0  ;;  %v1253_v2 = vpop.f32.mrb[30].mxu0 }
 0x122   : > { %v593_v4 = vadd.f32 %v1253_v2, %v1464_v39  ;;  %v587_v5 = vpop.f32.mrb[31].mxu0 }
 0x123   : > { %v588_v6 = vadd.f32 %v1464_v39, %v587_v5  ;;  %1300 = vmatprep.mubr.msk.f32.mxu1 %vm637_vm5, %v624_v1 }
 0x124   : > { %1301 = vmatmul.mubr.msk.f32.gmra.mrb[28].mxu1 %vm637_vm5, %v625_v3  ;;  %v627_v8 = vmax.f32 %v593_v4, 0.0 }
 0x125   : > { %v626_v7 = vmax.f32 %v588_v6, 0.0 }
 0x127   : > { %1303 = vmatprep.mubr.msk.f32.mxu1 %vm637_vm5, %v626_v7 }
 0x128   : > { %1304 = vmatmul.mubr.msk.f32.gmra.mrb[30].mxu1 %vm637_vm5, %v627_v8 }
 0x1bf   : > { %v1260_v39 = vpop.f32.mrb[0].mxu1 }
 0x1c0   : > { %v810_v10 = vadd.f32 %v1260_v39, %v1533_v9  ;;  %v804_v11 = vpop.f32.mrb[1].mxu1 }
 0x1c1   : > { %v805_v12 = vadd.f32 %v1533_v9, %v804_v11 }
 0x1c2   : > { %965 = vst.msk [vmem:[%s1540_s16 + $0x8] sm:$0xff] %vm963_vm6, %v810_v10 }
 0x1c3   : > { %964 = vst.msk [vmem:[%s1540_s16] sm:$0xff] %vm963_vm6, %v805_v12  ;;  %v1263_v13 = vpop.f32.mrb[2].mxu1 }
 0x1c4   : > { %v820_v14 = vadd.f32 %v1263_v13, %v1533_v9  ;;  %v814_v15 = vpop.f32.mrb[3].mxu1 }
 0x1c5   : > { %v815_v16 = vadd.f32 %v1533_v9, %v814_v15 }
 0x1c6   : > { %967 = vst.msk [vmem:[%s1540_s16 + $0x18] sm:$0xff] %vm963_vm6, %v820_v14 }
 0x1c7   : > { %966 = vst.msk [vmem:[%s1540_s16 + $0x10] sm:$0xff] %vm963_vm6, %v815_v16  ;;  %v1266_v17 = vpop.f32.mrb[4].mxu1 }
 0x1c8   : > { %v830_v18 = vadd.f32 %v1266_v17, %v1533_v9  ;;  %v824_v19 = vpop.f32.mrb[5].mxu1 }
 0x1c9   : > { %v825_v20 = vadd.f32 %v1533_v9, %v824_v19 }
 0x1ca   : > { %969 = vst.msk [vmem:[%s1540_s16 + $0x28] sm:$0xff] %vm963_vm6, %v830_v18 }
 0x1cb   : > { %968 = vst.msk [vmem:[%s1540_s16 + $0x20] sm:$0xff] %vm963_vm6, %v825_v20  ;;  %v1269_v21 = vpop.f32.mrb[6].mxu1 }
 0x1cc   : > { %v840_v22 = vadd.f32 %v1269_v21, %v1533_v9  ;;  %v834_v23 = vpop.f32.mrb[7].mxu1 }
 0x1cd   : > { %v835_v24 = vadd.f32 %v1533_v9, %v834_v23 }
 0x1ce   : > { %971 = vst.msk [vmem:[%s1540_s16 + $0x38] sm:$0xff] %vm963_vm6, %v840_v22 }
 0x1cf   : > { %970 = vst.msk [vmem:[%s1540_s16 + $0x30] sm:$0xff] %vm963_vm6, %v835_v24  ;;  %v1272_v25 = vpop.f32.mrb[8].mxu1 }
 0x1d0   : > { %v850_v26 = vadd.f32 %v1272_v25, %v1533_v9  ;;  %v844_v27 = vpop.f32.mrb[9].mxu1 }
 0x1d1   : > { %v845_v28 = vadd.f32 %v1533_v9, %v844_v27 }
 0x1d2   : > { %973 = vst.msk [vmem:[%s1540_s16 + $0x48] sm:$0xff] %vm963_vm6, %v850_v26 }
 0x1d3   : > { %972 = vst.msk [vmem:[%s1540_s16 + $0x40] sm:$0xff] %vm963_vm6, %v845_v28  ;;  %v1275_v29 = vpop.f32.mrb[10].mxu1 }
 0x1d4   : > { %v860_v30 = vadd.f32 %v1275_v29, %v1533_v9  ;;  %v854_v31 = vpop.f32.mrb[11].mxu1 }
 0x1d5   : > { %v855_v32 = vadd.f32 %v1533_v9, %v854_v31 }
 0x1d6   : > { %975 = vst.msk [vmem:[%s1540_s16 + $0x58] sm:$0xff] %vm963_vm6, %v860_v30 }
 0x1d7   : > { %974 = vst.msk [vmem:[%s1540_s16 + $0x50] sm:$0xff] %vm963_vm6, %v855_v32  ;;  %v1278_v33 = vpop.f32.mrb[12].mxu1 }
 0x1d8   : > { %v870_v34 = vadd.f32 %v1278_v33, %v1533_v9  ;;  %v864_v35 = vpop.f32.mrb[13].mxu1 }
 0x1d9   : > { %v865_v36 = vadd.f32 %v1533_v9, %v864_v35 }
 0x1da   : > { %977 = vst.msk [vmem:[%s1540_s16 + $0x68] sm:$0xff] %vm963_vm6, %v870_v34 }
 0x1db   : > { %976 = vst.msk [vmem:[%s1540_s16 + $0x60] sm:$0xff] %vm963_vm6, %v865_v36  ;;  %v1281_v37 = vpop.f32.mrb[14].mxu1 }
 0x1dc   : > { %v880_v38 = vadd.f32 %v1281_v37, %v1533_v9  ;;  %v874_v40 = vpop.f32.mrb[15].mxu1 }
 0x1dd   : > { %v875_v41 = vadd.f32 %v1533_v9, %v874_v40 }
 0x1de   : > { %979 = vst.msk [vmem:[%s1540_s16 + $0x78] sm:$0xff] %vm963_vm6, %v880_v38 }
 0x1df   : > { %978 = vst.msk [vmem:[%s1540_s16 + $0x70] sm:$0xff] %vm963_vm6, %v875_v41  ;;  %v1284_v42 = vpop.f32.mrb[16].mxu1 }
 0x1e0   : > { %v890_v43 = vadd.f32 %v1284_v42, %v1533_v9  ;;  %v884_v44 = vpop.f32.mrb[17].mxu1 }
 0x1e1   : > { %v885_v45 = vadd.f32 %v1533_v9, %v884_v44 }
 0x1e2   : > { %981 = vst.msk [vmem:[%s1540_s16 + $0x88] sm:$0xff] %vm963_vm6, %v890_v43 }
 0x1e3   : > { %980 = vst.msk [vmem:[%s1540_s16 + $0x80] sm:$0xff] %vm963_vm6, %v885_v45  ;;  %v1287_v46 = vpop.f32.mrb[18].mxu1 }
 0x1e4   : > { %v900_v47 = vadd.f32 %v1287_v46, %v1533_v9  ;;  %v894_v48 = vpop.f32.mrb[19].mxu1 }
 0x1e5   : > { %v895_v49 = vadd.f32 %v1533_v9, %v894_v48 }
 0x1e6   : > { %983 = vst.msk [vmem:[%s1540_s16 + $0x98] sm:$0xff] %vm963_vm6, %v900_v47 }
 0x1e7   : > { %982 = vst.msk [vmem:[%s1540_s16 + $0x90] sm:$0xff] %vm963_vm6, %v895_v49  ;;  %v1290_v50 = vpop.f32.mrb[20].mxu1 }
 0x1e8   : > { %v910_v51 = vadd.f32 %v1290_v50, %v1533_v9  ;;  %v904_v52 = vpop.f32.mrb[21].mxu1 }
 0x1e9   : > { %v905_v53 = vadd.f32 %v1533_v9, %v904_v52 }
 0x1ea   : > { %985 = vst.msk [vmem:[%s1540_s16 + $0xa8] sm:$0xff] %vm963_vm6, %v910_v51 }
 0x1eb   : > { %984 = vst.msk [vmem:[%s1540_s16 + $0xa0] sm:$0xff] %vm963_vm6, %v905_v53  ;;  %v1293_v54 = vpop.f32.mrb[22].mxu1 }
 0x1ec   : > { %v920_v55 = vadd.f32 %v1293_v54, %v1533_v9  ;;  %v914_v56 = vpop.f32.mrb[23].mxu1 }
 0x1ed   : > { %v915_v57 = vadd.f32 %v1533_v9, %v914_v56 }
 0x1ee   : > { %987 = vst.msk [vmem:[%s1540_s16 + $0xb8] sm:$0xff] %vm963_vm6, %v920_v55 }
 0x1ef   : > { %986 = vst.msk [vmem:[%s1540_s16 + $0xb0] sm:$0xff] %vm963_vm6, %v915_v57  ;;  %v1296_v58 = vpop.f32.mrb[24].mxu1 }
 0x1f0   : > { %v930_v59 = vadd.f32 %v1296_v58, %v1533_v9  ;;  %v924_v60 = vpop.f32.mrb[25].mxu1 }
 0x1f1   : > { %v925_v61 = vadd.f32 %v1533_v9, %v924_v60 }
 0x1f2   : > { %989 = vst.msk [vmem:[%s1540_s16 + $0xc8] sm:$0xff] %vm963_vm6, %v930_v59 }
 0x1f3   : > { %988 = vst.msk [vmem:[%s1540_s16 + $0xc0] sm:$0xff] %vm963_vm6, %v925_v61  ;;  %v1299_v62 = vpop.f32.mrb[26].mxu1 }
 0x1f4   : > { %v940_v63 = vadd.f32 %v1299_v62, %v1533_v9  ;;  %v934_v0 = vpop.f32.mrb[27].mxu1 }
 0x1f5   : > { %v935_v1 = vadd.f32 %v1533_v9, %v934_v0 }
 0x1f6   : > { %991 = vst.msk [vmem:[%s1540_s16 + $0xd8] sm:$0xff] %vm963_vm6, %v940_v63 }
 0x1f7   : > { %990 = vst.msk [vmem:[%s1540_s16 + $0xd0] sm:$0xff] %vm963_vm6, %v935_v1  ;;  %v1302_v2 = vpop.f32.mrb[28].mxu1 }
 0x1f8   : > { %v950_v3 = vadd.f32 %v1302_v2, %v1533_v9  ;;  %v944_v4 = vpop.f32.mrb[29].mxu1 }
 0x1f9   : > { %v945_v5 = vadd.f32 %v1533_v9, %v944_v4 }
 0x1fa   : > { %993 = vst.msk [vmem:[%s1540_s16 + $0xe8] sm:$0xff] %vm963_vm6, %v950_v3 }
 0x1fb   : > { %992 = vst.msk [vmem:[%s1540_s16 + $0xe0] sm:$0xff] %vm963_vm6, %v945_v5  ;;  %v1305_v6 = vpop.f32.mrb[30].mxu1 }
 0x1fc   : > { %v960_v7 = vadd.f32 %v1305_v6, %v1533_v9  ;;  %v954_v8 = vpop.f32.mrb[31].mxu1 }
 0x1fd   : > { %v955_v39 = vadd.f32 %v1533_v9, %v954_v8 }
 0x1fe   : > { %995 = vst.msk [vmem:[%s1540_s16 + $0xf8] sm:$0xff] %vm963_vm6, %v960_v7 }
 0x1ff   : > { %994 = vst.msk [vmem:[%s1540_s16 + $0xf0] sm:$0xff] %vm963_vm6, %v955_v39 }
 0x200 PF: > { %s15_s18 = sadd.s32 1, %s1331_s18  }
 0x201   : > { %p12_p4 = scmp.ge.s32.totalorder %s15_s18, 6  }
 0x203   :  { %14 = sbr.rel (!%p12_p4) target bundleno = 1 (0x1), region = 70 }

</bundles_post_ra>
